<compile_context>
chip_gen: v6e
topology: v6e:2x2x1
jax: 0.10.0
libtpu: 0.0.40
codegen_flags: <defaults>
</compile_context>

<pallas_src>
import functools
import math

import jax
import jax.numpy as jnp
from jax.experimental import pallas as pl
from jax.experimental.pallas import tpu as pltpu


def _round_up(x, m):
    return ((x + m - 1) // m) * m


def angle_resnet_kernel(
    s_ref,                      # [TM, C_IN]
    w_in_ref, b_in_ref,         # [C_IN, H], [1, H]
    w1_ref, b1_ref,             # [NB, H, H], [NB, 1, H]
    w2_ref, b2_ref,             # [NB, H, H], [NB, 1, H]
    w_out_ref, b_out_ref,       # [H, OUT_PAD], [1, OUT_PAD]
    out_ref,                    # [TM, OUT_PAD]
    *, no_blocks,
):
    x = s_ref[...].astype(jnp.float32)
    x = jnp.maximum(x, 0.0)                                        # relu(s)

    s = (
        jnp.dot(x, w_in_ref[...], preferred_element_type=jnp.float32)
        + b_in_ref[...]
    )                                                              # linear_in

    # Resnet blocks: static unroll over the (small) leading weight axis.
    for b in range(no_blocks):
        a = jnp.maximum(s, 0.0)
        a = (
            jnp.dot(a, w1_ref[b], preferred_element_type=jnp.float32)
            + b1_ref[b]
        )
        a = jnp.maximum(a, 0.0)
        a = (
            jnp.dot(a, w2_ref[b], preferred_element_type=jnp.float32)
            + b2_ref[b]
        )
        s = s + a                                                  # residual

    s = jnp.maximum(s, 0.0)                                        # relu
    out = (
        jnp.dot(s, w_out_ref[...], preferred_element_type=jnp.float32)
        + b_out_ref[...]
    )                                                              # linear_out
    out_ref[...] = out.astype(out_ref.dtype)


def angle_resnet(s, params, *, tile_m=256):
    """s: [*, c_in] -> [*, no_angles]."""
    (w_in, b_in, w1, b1, w2, b2, w_out, b_out) = params
    *batch, c_in = s.shape
    c_hidden = w_in.shape[1]
    no_blocks = w1.shape[0]
    no_angles = w_out.shape[1]

    M = int(math.prod(batch)) if batch else 1
    s2 = s.reshape(M, c_in)

    # Large M-tile (multiple of 8), capped to the (padded) problem size.
    tile_m = max(8, min(tile_m, _round_up(M, 8)))
    M_pad = _round_up(M, tile_m)
    if M_pad != M:
        s2 = jnp.pad(s2, ((0, M_pad - M), (0, 0)))

    # Lane-dense output: pad the (small) no_angles dim to a 128-lane multiple.
    out_pad = _round_up(no_angles, 128)
    w_out_p = jnp.pad(w_out, ((0, 0), (0, out_pad - no_angles)))
    b_out_p = jnp.pad(b_out, ((0, 0), (0, out_pad - no_angles)))

    full = lambda shape: pl.BlockSpec(shape, lambda i, _s=shape: (0,) * len(_s))

    kernel = functools.partial(angle_resnet_kernel, no_blocks=no_blocks)

    out = pl.pallas_call(
        kernel,
        out_shape=jax.ShapeDtypeStruct((M_pad, out_pad), s.dtype),
        grid_spec=pltpu.PrefetchScalarGridSpec(
            num_scalar_prefetch=0,
            grid=(M_pad // tile_m,),
            in_specs=[
                pl.BlockSpec((tile_m, c_in), lambda i: (i, 0)),     # s
                full(w_in.shape), full(b_in.shape),
                full(w1.shape), full(b1.shape),
                full(w2.shape), full(b2.shape),
                full(w_out_p.shape), full(b_out_p.shape),
            ],
            out_specs=pl.BlockSpec((tile_m, out_pad), lambda i: (i, 0)),
        ),
        compiler_params=pltpu.CompilerParams(
            dimension_semantics=("parallel",),   # lets v7x's 2 TCs split the grid
        ),
    )(s2, w_in, b_in, w1, b1, w2, b2, w_out_p, b_out_p)

    out = out[:M, :no_angles]
    return out.reshape(*batch, no_angles)


def reference(s, params):
    (w_in, b_in, w1, b1, w2, b2, w_out, b_out) = params
    x = jax.nn.relu(s)
    x = x @ w_in + b_in[0]
    for b in range(w1.shape[0]):
        a = jax.nn.relu(x)
        a = a @ w1[b] + b1[b, 0]
        a = jax.nn.relu(a)
        a = a @ w2[b] + b2[b, 0]
        x = x + a
    x = jax.nn.relu(x)
    return x @ w_out + b_out[0]


def init_params(key, c_in, c_hidden, no_blocks, no_angles):
    """PyTorch nn.Linear-style uniform(-1/sqrt(fan_in), 1/sqrt(fan_in)) init.

    Weights are stored as [fan_in, fan_out] so the kernel computes x @ W + b
    (equivalent to torch's x @ W.T + b)."""
    def lin(k, fan_in, fan_out):
        bound = 1.0 / math.sqrt(fan_in)
        kw, kb = jax.random.split(k)
        w = jax.random.uniform(kw, (fan_in, fan_out), jnp.float32, -bound, bound)
        b = jax.random.uniform(kb, (1, fan_out), jnp.float32, -bound, bound)
        return w, b

    keys = jax.random.split(key, 2 + 2 * no_blocks)
    w_in, b_in = lin(keys[0], c_in, c_hidden)
    w1s, b1s, w2s, b2s = [], [], [], []
    for i in range(no_blocks):
        w1, b1 = lin(keys[1 + 2 * i], c_hidden, c_hidden)
        w2, b2 = lin(keys[2 + 2 * i], c_hidden, c_hidden)
        w1s.append(w1); b1s.append(b1[None])
        w2s.append(w2); b2s.append(b2[None])
    w_out, b_out = lin(keys[-1], c_hidden, no_angles)
    return (
        w_in, b_in,
        jnp.stack(w1s), jnp.stack(b1s).reshape(no_blocks, 1, c_hidden),
        jnp.stack(w2s), jnp.stack(b2s).reshape(no_blocks, 1, c_hidden),
        w_out, b_out,
    )


if __name__ == "__main__":
    # Small shapes consistent with the module: [batch, seq, c_in] single embedding.
    B, N = 2, 8
    c_in, c_hidden, no_blocks, no_angles = 32, 32, 2, 7
    # epsilon of the original module is unused by this forward() variant.

    key = jax.random.PRNGKey(0)
    k_s, k_p = jax.random.split(key)
    s = jax.random.normal(k_s, (B, N, c_in), jnp.float32)
    params = init_params(k_p, c_in, c_hidden, no_blocks, no_angles)

    out = angle_resnet(s, params)
    out = jax.block_until_ready(out)

    ref = reference(s, params)
    assert out.shape == (B, N, no_angles)
    assert jnp.allclose(out, ref, atol=1e-4, rtol=1e-4), "mismatch vs reference"

    print("KERNEL_OK")
</pallas_src>

<mosaic_0001>
module attributes {stable_mosaic.version = 11 : i64} {
  func.func @angle_resnet_kernel(%arg0: i32, %arg1: memref<16x32xf32, #tpu.memory_space<vmem>>, %arg2: memref<32x32xf32, #tpu.memory_space<vmem>>, %arg3: memref<1x32xf32, #tpu.memory_space<vmem>>, %arg4: memref<2x32x32xf32, #tpu.memory_space<vmem>>, %arg5: memref<2x1x32xf32, #tpu.memory_space<vmem>>, %arg6: memref<2x32x32xf32, #tpu.memory_space<vmem>>, %arg7: memref<2x1x32xf32, #tpu.memory_space<vmem>>, %arg8: memref<32x128xf32, #tpu.memory_space<vmem>>, %arg9: memref<1x128xf32, #tpu.memory_space<vmem>>, %arg10: memref<16x128xf32, #tpu.memory_space<vmem>>) attributes {dimension_semantics = [#tpu.dimension_semantics<parallel>], iteration_bounds = array<i64: 1>, scalar_prefetch = 0 : i64, scratch_operands = 0 : i64, tpu.core_type = #tpu.core_type<tc>, window_params = [{transform_indices = @transform_0, window_bounds = array<i64: 16, 32>}, {pipeline_mode = #tpu.pipeline_mode<synchronous>, transform_indices = @transform_1, window_bounds = array<i64: 32, 32>}, {pipeline_mode = #tpu.pipeline_mode<synchronous>, transform_indices = @transform_2, window_bounds = array<i64: 1, 32>}, {pipeline_mode = #tpu.pipeline_mode<synchronous>, transform_indices = @transform_3, window_bounds = array<i64: 2, 32, 32>}, {pipeline_mode = #tpu.pipeline_mode<synchronous>, transform_indices = @transform_4, window_bounds = array<i64: 2, 1, 32>}, {pipeline_mode = #tpu.pipeline_mode<synchronous>, transform_indices = @transform_5, window_bounds = array<i64: 2, 32, 32>}, {pipeline_mode = #tpu.pipeline_mode<synchronous>, transform_indices = @transform_6, window_bounds = array<i64: 2, 1, 32>}, {pipeline_mode = #tpu.pipeline_mode<synchronous>, transform_indices = @transform_7, window_bounds = array<i64: 32, 128>}, {pipeline_mode = #tpu.pipeline_mode<synchronous>, transform_indices = @transform_8, window_bounds = array<i64: 1, 128>}, {transform_indices = @transform_9, window_bounds = array<i64: 16, 128>}]} {
    %c0 = arith.constant 0 : index
    %c0_0 = arith.constant 0 : index
    %0 = vector.load %arg1[%c0, %c0_0] : memref<16x32xf32, #tpu.memory_space<vmem>>, vector<16x32xf32>
    %cst = arith.constant 0.000000e+00 : f32
    %1 = vector.broadcast %cst : f32 to vector<16x32xf32>
    %2 = arith.maximumf %0, %1 : vector<16x32xf32>
    %c0_1 = arith.constant 0 : index
    %c0_2 = arith.constant 0 : index
    %3 = vector.load %arg2[%c0_1, %c0_2] : memref<32x32xf32, #tpu.memory_space<vmem>>, vector<32x32xf32>
    %cst_3 = arith.constant dense<0.000000e+00> : vector<16x32xf32>
    %4 = tpu.matmul %2, %3, %cst_3 {dimension_numbers = #tpu.dot_dimension_numbers<[1], [0], [0], [1], [0, 0, 1, 1], [], []>} : vector<16x32xf32>, vector<32x32xf32>, vector<16x32xf32> -> vector<16x32xf32>
    %c0_4 = arith.constant 0 : index
    %c0_5 = arith.constant 0 : index
    %5 = vector.load %arg3[%c0_4, %c0_5] : memref<1x32xf32, #tpu.memory_space<vmem>>, vector<1x32xf32>
    %6 = vector.broadcast %5 : vector<1x32xf32> to vector<16x32xf32>
    %7 = arith.addf %4, %6 : vector<16x32xf32>
    %cst_6 = arith.constant 0.000000e+00 : f32
    %8 = vector.broadcast %cst_6 : f32 to vector<16x32xf32>
    %9 = arith.maximumf %7, %8 : vector<16x32xf32>
    %c0_7 = arith.constant 0 : index
    %c0_8 = arith.constant 0 : index
    %c0_9 = arith.constant 0 : index
    %10 = vector.load %arg4[%c0_7, %c0_8, %c0_9] : memref<2x32x32xf32, #tpu.memory_space<vmem>>, vector<1x32x32xf32>
    %11 = vector.shape_cast %10 : vector<1x32x32xf32> to vector<32x32xf32>
    %cst_10 = arith.constant dense<0.000000e+00> : vector<16x32xf32>
    %12 = tpu.matmul %9, %11, %cst_10 {dimension_numbers = #tpu.dot_dimension_numbers<[1], [0], [0], [1], [0, 0, 1, 1], [], []>} : vector<16x32xf32>, vector<32x32xf32>, vector<16x32xf32> -> vector<16x32xf32>
    %c0_11 = arith.constant 0 : index
    %c0_12 = arith.constant 0 : index
    %c0_13 = arith.constant 0 : index
    %13 = vector.load %arg5[%c0_11, %c0_12, %c0_13] : memref<2x1x32xf32, #tpu.memory_space<vmem>>, vector<1x1x32xf32>
    %14 = vector.shape_cast %13 : vector<1x1x32xf32> to vector<1x32xf32>
    %15 = vector.broadcast %14 : vector<1x32xf32> to vector<16x32xf32>
    %16 = arith.addf %12, %15 : vector<16x32xf32>
    %cst_14 = arith.constant 0.000000e+00 : f32
    %17 = vector.broadcast %cst_14 : f32 to vector<16x32xf32>
    %18 = arith.maximumf %16, %17 : vector<16x32xf32>
    %c0_15 = arith.constant 0 : index
    %c0_16 = arith.constant 0 : index
    %c0_17 = arith.constant 0 : index
    %19 = vector.load %arg6[%c0_15, %c0_16, %c0_17] : memref<2x32x32xf32, #tpu.memory_space<vmem>>, vector<1x32x32xf32>
    %20 = vector.shape_cast %19 : vector<1x32x32xf32> to vector<32x32xf32>
    %cst_18 = arith.constant dense<0.000000e+00> : vector<16x32xf32>
    %21 = tpu.matmul %18, %20, %cst_18 {dimension_numbers = #tpu.dot_dimension_numbers<[1], [0], [0], [1], [0, 0, 1, 1], [], []>} : vector<16x32xf32>, vector<32x32xf32>, vector<16x32xf32> -> vector<16x32xf32>
    %c0_19 = arith.constant 0 : index
    %c0_20 = arith.constant 0 : index
    %c0_21 = arith.constant 0 : index
    %22 = vector.load %arg7[%c0_19, %c0_20, %c0_21] : memref<2x1x32xf32, #tpu.memory_space<vmem>>, vector<1x1x32xf32>
    %23 = vector.shape_cast %22 : vector<1x1x32xf32> to vector<1x32xf32>
    %24 = vector.broadcast %23 : vector<1x32xf32> to vector<16x32xf32>
    %25 = arith.addf %21, %24 : vector<16x32xf32>
    %26 = arith.addf %7, %25 : vector<16x32xf32>
    %cst_22 = arith.constant 0.000000e+00 : f32
    %27 = vector.broadcast %cst_22 : f32 to vector<16x32xf32>
    %28 = arith.maximumf %26, %27 : vector<16x32xf32>
    %c1 = arith.constant 1 : index
    %c0_23 = arith.constant 0 : index
    %c0_24 = arith.constant 0 : index
    %29 = vector.load %arg4[%c1, %c0_23, %c0_24] : memref<2x32x32xf32, #tpu.memory_space<vmem>>, vector<1x32x32xf32>
    %30 = vector.shape_cast %29 : vector<1x32x32xf32> to vector<32x32xf32>
    %cst_25 = arith.constant dense<0.000000e+00> : vector<16x32xf32>
    %31 = tpu.matmul %28, %30, %cst_25 {dimension_numbers = #tpu.dot_dimension_numbers<[1], [0], [0], [1], [0, 0, 1, 1], [], []>} : vector<16x32xf32>, vector<32x32xf32>, vector<16x32xf32> -> vector<16x32xf32>
    %c1_26 = arith.constant 1 : index
    %c0_27 = arith.constant 0 : index
    %c0_28 = arith.constant 0 : index
    %32 = vector.load %arg5[%c1_26, %c0_27, %c0_28] : memref<2x1x32xf32, #tpu.memory_space<vmem>>, vector<1x1x32xf32>
    %33 = vector.shape_cast %32 : vector<1x1x32xf32> to vector<1x32xf32>
    %34 = vector.broadcast %33 : vector<1x32xf32> to vector<16x32xf32>
    %35 = arith.addf %31, %34 : vector<16x32xf32>
    %cst_29 = arith.constant 0.000000e+00 : f32
    %36 = vector.broadcast %cst_29 : f32 to vector<16x32xf32>
    %37 = arith.maximumf %35, %36 : vector<16x32xf32>
    %c1_30 = arith.constant 1 : index
    %c0_31 = arith.constant 0 : index
    %c0_32 = arith.constant 0 : index
    %38 = vector.load %arg6[%c1_30, %c0_31, %c0_32] : memref<2x32x32xf32, #tpu.memory_space<vmem>>, vector<1x32x32xf32>
    %39 = vector.shape_cast %38 : vector<1x32x32xf32> to vector<32x32xf32>
    %cst_33 = arith.constant dense<0.000000e+00> : vector<16x32xf32>
    %40 = tpu.matmul %37, %39, %cst_33 {dimension_numbers = #tpu.dot_dimension_numbers<[1], [0], [0], [1], [0, 0, 1, 1], [], []>} : vector<16x32xf32>, vector<32x32xf32>, vector<16x32xf32> -> vector<16x32xf32>
    %c1_34 = arith.constant 1 : index
    %c0_35 = arith.constant 0 : index
    %c0_36 = arith.constant 0 : index
    %41 = vector.load %arg7[%c1_34, %c0_35, %c0_36] : memref<2x1x32xf32, #tpu.memory_space<vmem>>, vector<1x1x32xf32>
    %42 = vector.shape_cast %41 : vector<1x1x32xf32> to vector<1x32xf32>
    %43 = vector.broadcast %42 : vector<1x32xf32> to vector<16x32xf32>
    %44 = arith.addf %40, %43 : vector<16x32xf32>
    %45 = arith.addf %26, %44 : vector<16x32xf32>
    %cst_37 = arith.constant 0.000000e+00 : f32
    %46 = vector.broadcast %cst_37 : f32 to vector<16x32xf32>
    %47 = arith.maximumf %45, %46 : vector<16x32xf32>
    %c0_38 = arith.constant 0 : index
    %c0_39 = arith.constant 0 : index
    %48 = vector.load %arg8[%c0_38, %c0_39] : memref<32x128xf32, #tpu.memory_space<vmem>>, vector<32x128xf32>
    %cst_40 = arith.constant dense<0.000000e+00> : vector<16x128xf32>
    %49 = tpu.matmul %47, %48, %cst_40 {dimension_numbers = #tpu.dot_dimension_numbers<[1], [0], [0], [1], [0, 0, 1, 1], [], []>} : vector<16x32xf32>, vector<32x128xf32>, vector<16x128xf32> -> vector<16x128xf32>
    %c0_41 = arith.constant 0 : index
    %c0_42 = arith.constant 0 : index
    %50 = vector.load %arg9[%c0_41, %c0_42] : memref<1x128xf32, #tpu.memory_space<vmem>>, vector<1x128xf32>
    %51 = vector.broadcast %50 : vector<1x128xf32> to vector<16x128xf32>
    %52 = arith.addf %49, %51 : vector<16x128xf32>
    %c0_43 = arith.constant 0 : index
    %c0_44 = arith.constant 0 : index
    %53 = vector.load %arg10[%c0_43, %c0_44] : memref<16x128xf32, #tpu.memory_space<vmem>>, vector<16x128xf32>
    tpu.vector_store %arg10[%c0_43, %c0_44], %52 {strides = array<i32>} : memref<16x128xf32, #tpu.memory_space<vmem>>, vector<16x128xf32>,
    return
  }
  func.func @transform_0(%arg0: i32) -> (i32, i32) {
    %c0_i32 = arith.constant 0 : i32
    %c0_i32_0 = arith.constant 0 : i32
    return %arg0, %c0_i32 : i32, i32
  }
  func.func @transform_1(%arg0: i32) -> (i32, i32) {
    %c0_i32 = arith.constant 0 : i32
    %c0_i32_0 = arith.constant 0 : i32
    %c0_i32_1 = arith.constant 0 : i32
    return %c0_i32, %c0_i32_0 : i32, i32
  }
  func.func @transform_2(%arg0: i32) -> (i32, i32) {
    %c0_i32 = arith.constant 0 : i32
    %c0_i32_0 = arith.constant 0 : i32
    %c0_i32_1 = arith.constant 0 : i32
    return %c0_i32, %c0_i32_0 : i32, i32
  }
  func.func @transform_3(%arg0: i32) -> (i32, i32, i32) {
    %c0_i32 = arith.constant 0 : i32
    %c0_i32_0 = arith.constant 0 : i32
    %c0_i32_1 = arith.constant 0 : i32
    %c0_i32_2 = arith.constant 0 : i32
    return %c0_i32, %c0_i32_0, %c0_i32_1 : i32, i32, i32
  }
  func.func @transform_4(%arg0: i32) -> (i32, i32, i32) {
    %c0_i32 = arith.constant 0 : i32
    %c0_i32_0 = arith.constant 0 : i32
    %c0_i32_1 = arith.constant 0 : i32
    %c0_i32_2 = arith.constant 0 : i32
    return %c0_i32, %c0_i32_0, %c0_i32_1 : i32, i32, i32
  }
  func.func @transform_5(%arg0: i32) -> (i32, i32, i32) {
    %c0_i32 = arith.constant 0 : i32
    %c0_i32_0 = arith.constant 0 : i32
    %c0_i32_1 = arith.constant 0 : i32
    %c0_i32_2 = arith.constant 0 : i32
    return %c0_i32, %c0_i32_0, %c0_i32_1 : i32, i32, i32
  }
  func.func @transform_6(%arg0: i32) -> (i32, i32, i32) {
    %c0_i32 = arith.constant 0 : i32
    %c0_i32_0 = arith.constant 0 : i32
    %c0_i32_1 = arith.constant 0 : i32
    %c0_i32_2 = arith.constant 0 : i32
    return %c0_i32, %c0_i32_0, %c0_i32_1 : i32, i32, i32
  }
  func.func @transform_7(%arg0: i32) -> (i32, i32) {
    %c0_i32 = arith.constant 0 : i32
    %c0_i32_0 = arith.constant 0 : i32
    %c0_i32_1 = arith.constant 0 : i32
    return %c0_i32, %c0_i32_0 : i32, i32
  }
  func.func @transform_8(%arg0: i32) -> (i32, i32) {
    %c0_i32 = arith.constant 0 : i32
    %c0_i32_0 = arith.constant 0 : i32
    %c0_i32_1 = arith.constant 0 : i32
    return %c0_i32, %c0_i32_0 : i32, i32
  }
  func.func @transform_9(%arg0: i32) -> (i32, i32) {
    %c0_i32 = arith.constant 0 : i32
    %c0_i32_0 = arith.constant 0 : i32
    return %arg0, %c0_i32 : i32, i32
  }
}

</mosaic_0001>

<bundles_post_ra>
// kernel: tpu_custom_call.1
= control target key start
LH: loop header
LB: loop body
LE: loop exit
PB: predicated region body
PF: predicated region fallthrough
CT: control target
= control target key end

     0   :  { %14 = vsyncpa [#allocation3], 0  ;;  %s1079_s0 = inlined_call_operand.hbm [shape: f32[16,32], index: 0, kind: input, shape index: {}]   ;;  %s1080_s1 = inlined_call_operand.hbm [shape: f32[32,32], index: 1, kind: input, shape index: {}]   ;;  %s1081_s2 = inlined_call_operand.vmem [shape: f32[1,32], index: 2, kind: input, shape index: {}]   ;;  %s1082_s3 = inlined_call_operand.hbm [shape: f32[2,32,32], index: 3, kind: input, shape index: {}]   ;;  %s1083_s4 = inlined_call_operand.vmem [shape: f32[2,1,32], index: 4, kind: input, shape index: {}]   ;;  %s1084_s5 = inlined_call_operand.hbm [shape: f32[2,32,32], index: 5, kind: input, shape index: {}]   ;;  %s1085_s6 = inlined_call_operand.vmem [shape: f32[2,1,32], index: 6, kind: input, shape index: {}]   ;;  %s1086_s7 = inlined_call_operand.hbm [shape: f32[32,128], index: 7, kind: input, shape index: {}]   ;;  %s1087_s8 = inlined_call_operand.vmem [shape: f32[1,128], index: 8, kind: input, shape index: {}]   ;;  %s1088_s9 = inlined_call_operand.hbm [shape: f32[16,128], index: 9, kind: output, shape index: {}]  }
   0x1   :  { %15 = vsyncpa [#allocation6], 0 }
   0x2   :  { %16 = vsyncpa [#allocation9], 0 }
   0x3   :  { %17 = vsyncpa [#allocation4], 0  ;;  %s955_s30 = smov [#allocation5]   ;;  %s956_s11 = smov [#allocation8]  }
   0x4   :  { %s35_s10 = sshll.u32 %s955_s30, 4  ;;  %s63_s12 = sshll.u32 %s956_s11, 4  ;;  %s36_s10 = int_to_ptr.vmem [resolvable:$true] %s35_s10  ;;  %s64_s12 = int_to_ptr.vmem [resolvable:$true] %s63_s12 }
   0x5   :  { %s835_s13 = scalar_lea.vmem %s36_s10, 512  ;;  %p840_p1 = scmp.lt.s32.totalorder %s36_s10, %s36_s10 }
   0x6   :  { %p836_p0 = scmp.ne.s32.totalorder %s36_s10, %s835_s13  ;;  %p841_p2 = scmp.lt.s32.totalorder %s835_s13, %s835_s13 }
   0x8   :  { %p842_p3 = por %p841_p2, %p840_p1 }
   0xa   :  { %p843_p4 = pnand %p842_p3, %p836_p0 }
   0xc   :  { %846 = shalt.err (!%p843_p4)
}
   0xd   :  { %s957_s14 = smov 128   ;;  %s958_s15 = smov 8  }
   0xe   :  { %41 = dma.hbm_to_vmem [thread:$0]  %s1080_s1, 512, %s36_s10, [#allocation6], %s957_s14, %s957_s14, %s958_s15  }
   0xf   :  { %s855_s18 = scalar_lea.vmem %s64_s12, 1024  ;;  %p860_p6 = scmp.lt.s32.totalorder %s64_s12, %s64_s12 }
  0x10   :  { %p856_p5 = scmp.ne.s32.totalorder %s64_s12, %s855_s18  ;;  %p861_p7 = scmp.lt.s32.totalorder %s855_s18, %s855_s18 }
  0x12   :  { %p862_p8 = por %p861_p7, %p860_p6 }
  0x14   :  { %p863_p9 = pnand %p862_p8, %p856_p5 }
  0x16   :  { %866 = shalt.err (!%p863_p9)
}
  0x17   :  { %69 = dma.hbm_to_vmem [thread:$0]  %s1084_s5, 1024, %s64_s12, [#allocation9], %s957_s14, %s957_s14, %s958_s15  }
  0x18   :  { %s959_s21 = smov [#allocation2]   ;;  %s960_s23 = smov [#allocation7]  }
  0x19   :  { %s23_s22 = sshll.u32 %s959_s21, 4  ;;  %s49_s24 = sshll.u32 %s960_s23, 4  ;;  %s24_s22 = int_to_ptr.vmem [resolvable:$true] %s23_s22  ;;  %s50_s24 = int_to_ptr.vmem [resolvable:$true] %s49_s24 }
  0x1a   :  { %s875_s1 = scalar_lea.vmem %s24_s22, 256  ;;  %p880_p11 = scmp.lt.s32.totalorder %s24_s22, %s24_s22 }
  0x1b   :  { %p876_p10 = scmp.ne.s32.totalorder %s24_s22, %s875_s1  ;;  %p881_p12 = scmp.lt.s32.totalorder %s875_s1, %s875_s1 }
  0x1d   :  { %p882_p13 = por %p881_p12, %p880_p11 }
  0x1f   :  { %p883_p0 = pnand %p882_p13, %p876_p10 }
  0x21   :  { %886 = shalt.err (!%p883_p0)
}
  0x22   :  { %29 = dma.hbm_to_vmem [thread:$0]  %s1079_s0, 256, %s24_s22, [#allocation3], %s957_s14, %s957_s14, %s958_s15  }
  0x23   :  { %s895_s5 = scalar_lea.vmem %s50_s24, 1024  ;;  %p900_p2 = scmp.lt.s32.totalorder %s50_s24, %s50_s24 }
  0x24   :  { %p896_p1 = scmp.ne.s32.totalorder %s50_s24, %s895_s5  ;;  %p901_p3 = scmp.lt.s32.totalorder %s895_s5, %s895_s5 }
  0x26   :  { %p902_p4 = por %p901_p3, %p900_p2 }
  0x28   :  { %p903_p5 = pnand %p902_p4, %p896_p1 }
  0x2a   :  { %906 = shalt.err (!%p903_p5)
}
  0x2b   :  { %55 = dma.hbm_to_vmem [thread:$0]  %s1082_s3, 1024, %s50_s24, [#allocation6], %s957_s14, %s957_s14, %s958_s15  }
  0x2c   :  { %s961_s29 = smov [#allocation10]  }
  0x2d   :  { %s77_s30 = sshll.u32 %s961_s29, 4  ;;  %s78_s30 = int_to_ptr.vmem [resolvable:$true] %s77_s30 }
  0x2e   :  { %s915_s10 = scalar_lea.vmem %s78_s30, 512  ;;  %p920_p7 = scmp.lt.s32.totalorder %s78_s30, %s78_s30 }
  0x2f   :  { %p916_p6 = scmp.ne.s32.totalorder %s78_s30, %s915_s10  ;;  %p921_p8 = scmp.lt.s32.totalorder %s915_s10, %s915_s10 }
  0x31   :  { %p922_p9 = por %p921_p8, %p920_p7 }
  0x33   :  { %p923_p10 = pnand %p922_p9, %p916_p6 }
  0x35   :  { %926 = shalt.err (!%p923_p10)
}
  0x36   :  { %83 = dma.hbm_to_vmem [thread:$0]  %s1086_s7, 512, %s78_s30, [#allocation9], %s957_s14, %s957_s14, %s958_s15  }
  0x37   :  { %947 = dma.done.wait [#allocation3], 256  }
  0x38   :  { %948 = vsyncadd [#allocation3], 4294967040 }
  0x39   :  { %949 = dma.done.wait [#allocation6], 1536  }
  0x3a   :  { %950 = vsyncadd [#allocation6], 4294965760 }
  0x3b   :  { %951 = dma.done.wait [#allocation9], 1536  }
  0x3c   :  { %952 = vsyncadd [#allocation9], 4294965760  ;;  %v108_v0 = vld [vmem:[#allocation5 + $0x18] sm:$0xff]  ;;  %v107_v1 = vld [vmem:[#allocation5 + $0x10] sm:$0xff]  ;;  %vm116_vm0 = vcmask 261120   ;;  %s962_s22 = smov [#allocation11]  }
  0x3d   :  { %753 = vmatprep.subr.mxu0 %v108_v0  ;;  %v101_v2 = vld [vmem:[#allocation2] sm:$0xff]  ;;  %v106_v3 = vld [vmem:[#allocation5 + $0x8] sm:$0xff]  ;;  %v102_v5 = vld [vmem:[#allocation2 + $0x8] sm:$0xff]  ;;  %s683_s23 = sshll.u32 %s962_s22, 4  ;;  %s684_s23 = int_to_ptr.vmem [resolvable:$true] %s683_s23 }
  0x3e   :  { %754 = vmatpush3.msra.mxu0 %v108_v0  ;;  %v103_v4 = vmax.f32 %v101_v2, 0.0  ;;  %v105_v6 = vld [vmem:[#allocation5] sm:$0xff]  ;;  %v104_v7 = vmax.f32 %v102_v5, 0.0  ;;  %v203_v8 = vld [vmem:[#allocation7 + $0x18] sm:$0xff]  ;;  %v202_v9 = vld [vmem:[#allocation7 + $0x10] sm:$0xff]  ;;  %p932_p12 = scmp.lt.s32.totalorder %s684_s23, %s684_s23 }
  0x3f   :  { %755 = vmatprep.subr.mxu0 %v107_v1  ;;  %764 = vmatprep.subr.mxu1 %v203_v8  ;;  %v201_v10 = vld [vmem:[#allocation7 + $0x8] sm:$0xff]  ;;  %v200_v11 = vld [vmem:[#allocation7] sm:$0xff]  ;;  %v697_v12 = vld [vmem:[%s1081_s2] ss:$0 sm:$0xff] }
  0x40   :  { %756 = vmatpush3.msra.mxu0 %v107_v1  ;;  %761 = vmatprep.mubr.msk.f32.mxu0 %vm116_vm0, %v103_v4  ;;  %v297_v19 = vld [vmem:[#allocation8 + $0x18] sm:$0xff]  ;;  %v296_v20 = vld [vmem:[#allocation8 + $0x10] sm:$0xff]  ;;  %v295_v21 = vld [vmem:[#allocation8 + $0x8] sm:$0xff] }
  0x41   :  { %757 = vmatprep.subr.mxu0 %v106_v3  ;;  %765 = vmatpush3.msra.mxu1 %v203_v8  ;;  %v294_v22 = vld [vmem:[#allocation8] sm:$0xff]  ;;  %v700_v23 = vld [vmem:[%s1083_s4] ss:$0 sm:$0xff]  ;;  %v394_v30 = vld [vmem:[#allocation7 + $0x38] sm:$0xff] }
  0x42   :  { %758 = vmatpush3.msra.mxu0 %v106_v3  ;;  %766 = vmatprep.subr.mxu1 %v202_v9  ;;  %v393_v31 = vld [vmem:[#allocation7 + $0x30] sm:$0xff]  ;;  %v392_v32 = vld [vmem:[#allocation7 + $0x28] sm:$0xff]  ;;  %v391_v33 = vld [vmem:[#allocation7 + $0x20] sm:$0xff] }
  0x43   :  { %759 = vmatprep.subr.mxu0 %v105_v6  ;;  %767 = vmatpush3.msra.mxu1 %v202_v9  ;;  %v703_v34 = vld [vmem:[%s1085_s6] ss:$0 sm:$0xff]  ;;  %v490_v43 = vld [vmem:[#allocation8 + $0x38] sm:$0xff]  ;;  %v488_v45 = vld [vmem:[#allocation8 + $0x28] sm:$0xff] }
  0x44   :  { %760 = vmatpush3.msra.mxu0 %v105_v6  ;;  %768 = vmatprep.subr.mxu1 %v201_v10  ;;  %v489_v44 = vld [vmem:[#allocation8 + $0x30] sm:$0xff]  ;;  %v487_v46 = vld [vmem:[#allocation8 + $0x20] sm:$0xff]  ;;  %v587_v54 = vld [vmem:[#allocation10 + $0x18] sm:$0xff] }
  0x45   :  { %762 = vmatmul.mubr.msk.f32.vlgmr.msra.gmra.mxu0 %vm116_vm0, %v104_v7  ;;  %769 = vmatpush3.msra.mxu1 %v201_v10  ;;  %v707_v47 = vld [vmem:[%s1083_s4 + $0x1] ss:$0 sm:$0xff]  ;;  %v585_v56 = vld [vmem:[#allocation10 + $0x8] sm:$0xff]  ;;  %v584_v57 = vld [vmem:[#allocation10] sm:$0xff] }
  0x46   :  { %770 = vmatprep.subr.mxu1 %v200_v11  ;;  %775 = vmatprep.subr.mxu0 %v297_v19  ;;  %v586_v55 = vld [vmem:[#allocation10 + $0x10] sm:$0xff] }
  0x47   :  { %771 = vmatpush3.msra.mxu1 %v200_v11  ;;  %776 = vmatpush3.msra.mxu0 %v297_v19  ;;  %v711_v58 = vld [vmem:[%s1085_s6 + $0x1] ss:$0 sm:$0xff]  ;;  %v714_v3 = vld [vmem:[%s1087_s8] ss:$0 sm:$0xff]  ;;  %s927_s6 = scalar_lea.vmem %s684_s23, 256 }
  0x48   :  { %777 = vmatprep.subr.mxu0 %v296_v20  ;;  %786 = vmatprep.subr.mxu1 %v394_v30  ;;  %p928_p11 = scmp.ne.s32.totalorder %s684_s23, %s927_s6  ;;  %p933_p13 = scmp.lt.s32.totalorder %s927_s6, %s927_s6 }
  0x49   :  { %778 = vmatpush3.msra.mxu0 %v296_v20 }
  0x4a   :  { %779 = vmatprep.subr.mxu0 %v295_v21  ;;  %p934_p0 = por %p933_p13, %p932_p12 }
  0x4b   :  { %780 = vmatpush3.msra.mxu0 %v295_v21 }
  0x4c   :  { %781 = vmatprep.subr.mxu0 %v294_v22  ;;  %p935_p1 = pnand %p934_p0, %p928_p11 }
  0x4d   :  { %782 = vmatpush3.msra.mxu0 %v294_v22 }
  0x4e   :  { %797 = vmatprep.subr.mxu0 %v490_v43 }
 0x105   :  { %v763_v13 = vpop.f32.mrf.mxu0 }
 0x106   :  { %v195_v14 = vadd.f32 %v763_v13, %v697_v12 }
 0x107   :  { %v189_v15 = vpop.f32.mrf.mxu0 }
 0x108   :  { %v190_v16 = vadd.f32 %v697_v12, %v189_v15  ;;  %v199_v18 = vmax.f32 %v195_v14, 0.0 }
 0x10a   :  { %v198_v17 = vmax.f32 %v190_v16, 0.0 }
 0x10c   :  { %772 = vmatprep.mubr.msk.f32.mxu1 %vm116_vm0, %v198_v17 }
 0x10d   :  { %773 = vmatmul.mubr.msk.f32.vlgmr.msra.gmra.mxu1 %vm116_vm0, %v199_v18 }
 0x10e   :  { %787 = vmatpush3.msra.mxu1 %v394_v30 }
 0x10f   :  { %788 = vmatprep.subr.mxu1 %v393_v31 }
 0x110   :  { %789 = vmatpush3.msra.mxu1 %v393_v31 }
 0x111   :  { %790 = vmatprep.subr.mxu1 %v392_v32 }
 0x112   :  { %791 = vmatpush3.msra.mxu1 %v392_v32 }
 0x113   :  { %792 = vmatprep.subr.mxu1 %v391_v33 }
 0x114   :  { %793 = vmatpush3.msra.mxu1 %v391_v33 }
 0x115   :  { %808 = vmatprep.subr.mxu1 %v587_v54 }
 0x1cd   :  { %v774_v24 = vpop.f32.mrf.mxu1 }
 0x1ce   :  { %v289_v25 = vadd.f32 %v774_v24, %v700_v23 }
 0x1cf   :  { %v283_v26 = vpop.f32.mrf.mxu1 }
 0x1d0   :  { %v284_v27 = vadd.f32 %v700_v23, %v283_v26  ;;  %v293_v29 = vmax.f32 %v289_v25, 0.0 }
 0x1d2   :  { %v292_v28 = vmax.f32 %v284_v27, 0.0 }
 0x1d4   :  { %783 = vmatprep.mubr.msk.f32.mxu0 %vm116_vm0, %v292_v28 }
 0x1d5   :  { %784 = vmatmul.mubr.msk.f32.vlgmr.msra.gmra.mxu0 %vm116_vm0, %v293_v29 }
 0x1d6   :  { %798 = vmatpush3.msra.mxu0 %v490_v43 }
 0x1d7   :  { %799 = vmatprep.subr.mxu0 %v489_v44 }
 0x1d8   :  { %800 = vmatpush3.msra.mxu0 %v489_v44 }
 0x1d9   :  { %801 = vmatprep.subr.mxu0 %v488_v45 }
 0x1da   :  { %802 = vmatpush3.msra.mxu0 %v488_v45 }
 0x1db   :  { %803 = vmatprep.subr.mxu0 %v487_v46 }
 0x1dc   :  { %804 = vmatpush3.msra.mxu0 %v487_v46 }
 0x295   :  { %v785_v35 = vpop.f32.mrf.mxu0 }
 0x296   :  { %v383_v36 = vadd.f32 %v785_v35, %v703_v34 }
 0x297   :  { %v377_v37 = vpop.f32.mrf.mxu0 }
 0x298   :  { %v378_v38 = vadd.f32 %v703_v34, %v377_v37  ;;  %v387_v39 = vadd.f32 %v383_v36, %v195_v14 }
 0x29a   :  { %v386_v40 = vadd.f32 %v378_v38, %v190_v16  ;;  %v389_v42 = vmax.f32 %v387_v39, 0.0 }
 0x29c   :  { %v388_v41 = vmax.f32 %v386_v40, 0.0 }
 0x29e   :  { %794 = vmatprep.mubr.msk.f32.mxu1 %vm116_vm0, %v388_v41 }
 0x29f   :  { %795 = vmatmul.mubr.msk.f32.vlgmr.msra.gmra.mxu1 %vm116_vm0, %v389_v42 }
 0x2a0   :  { %809 = vmatpush3.msra.mxu1 %v587_v54 }
 0x2a1   :  { %810 = vmatprep.subr.mxu1 %v586_v55 }
 0x2a2   :  { %811 = vmatpush3.msra.mxu1 %v586_v55 }
 0x2a3   :  { %812 = vmatprep.subr.mxu1 %v585_v56 }
 0x2a4   :  { %813 = vmatpush3.msra.mxu1 %v585_v56 }
 0x2a5   :  { %814 = vmatprep.subr.mxu1 %v584_v57 }
 0x2a6   :  { %815 = vmatpush3.msra.mxu1 %v584_v57 }
 0x35f   :  { %v796_v48 = vpop.f32.mrf.mxu1 }
 0x360   :  { %v481_v49 = vadd.f32 %v796_v48, %v707_v47 }
 0x361   :  { %v475_v50 = vpop.f32.mrf.mxu1 }
 0x362   :  { %v476_v51 = vadd.f32 %v707_v47, %v475_v50  ;;  %v485_v53 = vmax.f32 %v481_v49, 0.0 }
 0x364   :  { %v484_v52 = vmax.f32 %v476_v51, 0.0 }
 0x366   :  { %805 = vmatprep.mubr.msk.f32.mxu0 %vm116_vm0, %v484_v52 }
 0x367   :  { %806 = vmatmul.mubr.msk.f32.vlgmr.msra.gmra.mxu0 %vm116_vm0, %v485_v53 }
 0x427   :  { %v807_v59 = vpop.f32.mrf.mxu0 }
 0x428   :  { %v577_v60 = vadd.f32 %v807_v59, %v711_v58 }
 0x429   :  { %v571_v61 = vpop.f32.mrf.mxu0 }
 0x42a   :  { %v572_v62 = vadd.f32 %v711_v58, %v571_v61  ;;  %v581_v63 = vadd.f32 %v577_v60, %v387_v39 }
 0x42c   :  { %v580_v0 = vadd.f32 %v572_v62, %v386_v40  ;;  %v583_v2 = vmax.f32 %v581_v63, 0.0 }
 0x42e   :  { %v582_v1 = vmax.f32 %v580_v0, 0.0 }
 0x430   :  { %816 = vmatprep.mubr.msk.f32.mxu1 %vm116_vm0, %v582_v1 }
 0x431   :  { %817 = vmatmul.mubr.msk.f32.vlgmr.msra.gmra.mxu1 %vm116_vm0, %v583_v2 }
 0x4f1   :  { %v818_v4 = vpop.f32.mrf.mxu1 }
 0x4f2   :  { %v673_v5 = vadd.f32 %v818_v4, %v714_v3 }
 0x4f3   :  { %v667_v6 = vpop.f32.mrf.mxu1 }
 0x4f4   :  { %677 = vst [vmem:[#allocation11 + $0x8] sm:$0xff] %v673_v5  ;;  %v668_v7 = vadd.f32 %v714_v3, %v667_v6 }
 0x4f6   :  { %676 = vst [vmem:[#allocation11] sm:$0xff] %v668_v7 }
 0x4f7   :  { %938 = shalt.err (!%p935_p1)
}
 0x4f8   :  { %689 = dma.vmem_to_hbm [thread:$0]  %s684_s23, 256, %s1088_s9, [#allocation4], %s957_s14, %s957_s14, %s958_s15  }
 0x4f9   :  { %953 = dma.done.wait [#allocation4], 256  }
 0x4fa   :  { %954 = vsyncadd [#allocation4], 4294967040 }
 0x4fb   :  { %693 = vsyncpa [#allocation3], 1 }
 0x4fc   :  { %694 = vsyncpa [#allocation6], 1 }
 0x4fd   :  { %695 = vsyncpa [#allocation9], 1 }
 0x4fe   :  { %696 = vsyncpa [#allocation4], 1 }

</bundles_post_ra>
